<compile_context>
chip_gen: v5e
topology: v5e:2x2
jax: 0.10.0
libtpu: 0.0.40
codegen_flags: <defaults>
</compile_context>

<pallas_src>
import functools

import jax
import jax.numpy as jnp
from jax.experimental import pallas as pl
from jax.experimental.pallas import tpu as pltpu


# ----------------------------------------------------------------------------
# Fused Pallas kernel: standardize -> (Linear + ReLU)* -> Linear
# ----------------------------------------------------------------------------
def _fcnet_fused_kernel(*refs, mean, inv_std, n_layers):
    # refs = (x_ref, w0, b0, w1, b1, ..., w_{L-1}, b_{L-1}, o_ref)
    x_ref = refs[0]
    o_ref = refs[-1]
    wb = refs[1:-1]

    # scalar standardize, fused with the first matmul's input load (VPU work
    # is hidden under the MXU; keeping it in-kernel avoids an extra XLA op)
    h = (x_ref[...] - mean) * inv_std

    for i in range(n_layers):
        w = wb[2 * i][...]
        b = wb[2 * i + 1][...]
        # MXU matmul with f32 accumulation; bias + ReLU epilogue on the VPU.
        h = jnp.dot(h, w, preferred_element_type=jnp.float32) + b
        if i < n_layers - 1:  # hidden layers get ReLU; final fc head does not
            h = jnp.maximum(h, 0.0)

    o_ref[...] = h.astype(o_ref.dtype)


# ----------------------------------------------------------------------------
# Wrapper: pad to lane/sublane-friendly shapes + single pallas_call
# ----------------------------------------------------------------------------
def _round_up(n, m):
    return ((n + m - 1) // m) * m


def _pad_params(params, k0_pad):
    """Zero-pad each (w, b) so every in/out feature dim is a multiple of 128."""
    padded = []
    k_prev = k0_pad
    for w, b in params:
        k_in, n_out = w.shape
        n_pad = _round_up(n_out, 128)
        w_p = jnp.zeros((k_prev, n_pad), w.dtype).at[:k_in, :n_out].set(w)
        b_p = jnp.zeros((1, n_pad), b.dtype).at[0, :n_out].set(b)
        padded.append((w_p, b_p))
        k_prev = n_pad
    return padded


def fcnet_forward(x, params, standardize_mean, standardize_std):
    """params: list of (w, b) with w shape (in, out); last entry is the 'fc' head.

    Computes: flatten((x - mean)/std) -> [x@W+b; ReLU]* -> x@W+b
    (PyTorch Linear equivalence: W_pt = W.T).
    """
    B = x.shape[0]
    c_dim = params[-1][0].shape[1]

    # flatten like x.view(x.shape[0], -1) BEFORE the kernel (lane-dense 2-D view)
    x2 = x.reshape(B, -1)
    K0 = x2.shape[1]

    # pad batch to a sublane multiple (8) and features to a lane multiple (128)
    Bp = _round_up(max(B, 1), 8)
    K0p = _round_up(K0, 128)
    x_p = jnp.zeros((Bp, K0p), x2.dtype).at[:B, :K0].set(x2)

    padded = _pad_params(params, K0p)
    n_layers = len(padded)
    Np_last = padded[-1][0].shape[1]

    flat_args = [x_p]
    in_specs = [pl.BlockSpec((Bp, K0p), lambda: (0, 0))]
    for w_p, b_p in padded:
        flat_args += [w_p, b_p]
        in_specs += [
            pl.BlockSpec(w_p.shape, lambda: (0, 0)),
            pl.BlockSpec(b_p.shape, lambda: (0, 0)),
        ]

    kern = functools.partial(
        _fcnet_fused_kernel,
        mean=float(standardize_mean),
        inv_std=1.0 / float(standardize_std),
        n_layers=n_layers,
    )

    # TODO(synk): for much larger configs (C*H*W or hidden >> 4096, or large
    # batch), add a parallel batch-tile grid axis and tile K with a VMEM
    # accumulator; at these sizes a single whole-array block is optimal.
    out_p = pl.pallas_call(
        kern,
        out_shape=jax.ShapeDtypeStruct((Bp, Np_last), x.dtype),
        in_specs=in_specs,
        out_specs=pl.BlockSpec((Bp, Np_last), lambda: (0, 0)),
        compiler_params=pltpu.CompilerParams(vmem_limit_bytes=64 << 20),
    )(*flat_args)

    return out_p[:B, :c_dim]


# ----------------------------------------------------------------------------
# Parameter init (nn.Linear-style fan-in uniform, stored as (in, out))
# ----------------------------------------------------------------------------
def init_params(key, all_units, c_dim, dtype=jnp.float32):
    sizes = list(all_units) + [c_dim]
    params = []
    for i in range(len(sizes) - 1):
        fan_in, fan_out = sizes[i], sizes[i + 1]
        key, kw, kb = jax.random.split(key, 3)
        bound = 1.0 / float(fan_in) ** 0.5
        w = jax.random.uniform(kw, (fan_in, fan_out), dtype, -bound, bound)
        b = jax.random.uniform(kb, (fan_out,), dtype, -bound, bound)
        params.append((w, b))
    return params


if __name__ == "__main__":
    # module config: dims=(4,16,16), units=[[128],[64]], c_dim=10,
    # cfg.activation='relu', cfg.norm='none', cfg.dropout=0.0 (eval mode)
    import numpy as np

    dims = (4, 16, 16)
    units = [[128], [64]]
    c_dim = 10
    B = 2

    all_units = [int(np.prod(dims))] + [u for grp in units for u in grp]  # [1024, 128, 64]

    key = jax.random.PRNGKey(0)
    key, kx = jax.random.split(key)
    x = jax.random.normal(kx, (B,) + dims, dtype=jnp.float32)  # NCHW input

    params = init_params(key, all_units, c_dim)
    std_mean, std_std = 0.5, 2.0  # Standardize(mean, std)

    out = fcnet_forward(x, params, std_mean, std_std)
    out = jax.block_until_ready(out)
    assert out.shape == (B, c_dim), out.shape

    # sanity check against a pure-JAX reference
    ref = (x - std_mean) / std_std
    ref = ref.reshape(B, -1)
    for w, b in params[:-1]:
        ref = jnp.maximum(ref @ w + b, 0.0)
    w, b = params[-1]
    ref = ref @ w + b
    assert jnp.allclose(out, ref, atol=1e-4, rtol=1e-4), float(jnp.abs(out - ref).max())

    print("KERNEL_OK")
</pallas_src>

<mosaic_0001>
module attributes {stable_mosaic.version = 11 : i64} {
  func.func @_fcnet_fused_kernel(%arg0: memref<8x1024xf32, #tpu.memory_space<vmem>>, %arg1: memref<1024x128xf32, #tpu.memory_space<vmem>>, %arg2: memref<1x128xf32, #tpu.memory_space<vmem>>, %arg3: memref<128x128xf32, #tpu.memory_space<vmem>>, %arg4: memref<1x128xf32, #tpu.memory_space<vmem>>, %arg5: memref<128x128xf32, #tpu.memory_space<vmem>>, %arg6: memref<1x128xf32, #tpu.memory_space<vmem>>, %arg7: memref<8x128xf32, #tpu.memory_space<vmem>>) attributes {dimension_semantics = [], scalar_prefetch = 0 : i64, scratch_operands = 0 : i64, tpu.core_type = #tpu.core_type<tc>} {
    %c0 = arith.constant 0 : index
    %c0_0 = arith.constant 0 : index
    %0 = vector.load %arg0[%c0, %c0_0] : memref<8x1024xf32, #tpu.memory_space<vmem>>, vector<8x1024xf32>
    %cst = arith.constant 5.000000e-01 : f32
    %1 = vector.broadcast %cst : f32 to vector<8x1024xf32>
    %2 = arith.subf %0, %1 : vector<8x1024xf32>
    %cst_1 = arith.constant 5.000000e-01 : f32
    %3 = vector.broadcast %cst_1 : f32 to vector<8x1024xf32>
    %4 = arith.mulf %2, %3 : vector<8x1024xf32>
    %c0_2 = arith.constant 0 : index
    %c0_3 = arith.constant 0 : index
    %5 = vector.load %arg1[%c0_2, %c0_3] : memref<1024x128xf32, #tpu.memory_space<vmem>>, vector<1024x128xf32>
    %c0_4 = arith.constant 0 : index
    %c0_5 = arith.constant 0 : index
    %6 = vector.load %arg2[%c0_4, %c0_5] : memref<1x128xf32, #tpu.memory_space<vmem>>, vector<1x128xf32>
    %cst_6 = arith.constant dense<0.000000e+00> : vector<8x128xf32>
    %7 = tpu.matmul %4, %5, %cst_6 {dimension_numbers = #tpu.dot_dimension_numbers<[1], [0], [0], [1], [0, 0, 1, 1], [], []>} : vector<8x1024xf32>, vector<1024x128xf32>, vector<8x128xf32> -> vector<8x128xf32>
    %8 = vector.broadcast %6 : vector<1x128xf32> to vector<8x128xf32>
    %9 = arith.addf %7, %8 : vector<8x128xf32>
    %cst_7 = arith.constant 0.000000e+00 : f32
    %10 = vector.broadcast %cst_7 : f32 to vector<8x128xf32>
    %11 = arith.maximumf %9, %10 : vector<8x128xf32>
    %c0_8 = arith.constant 0 : index
    %c0_9 = arith.constant 0 : index
    %12 = vector.load %arg3[%c0_8, %c0_9] : memref<128x128xf32, #tpu.memory_space<vmem>>, vector<128x128xf32>
    %c0_10 = arith.constant 0 : index
    %c0_11 = arith.constant 0 : index
    %13 = vector.load %arg4[%c0_10, %c0_11] : memref<1x128xf32, #tpu.memory_space<vmem>>, vector<1x128xf32>
    %cst_12 = arith.constant dense<0.000000e+00> : vector<8x128xf32>
    %14 = tpu.matmul %11, %12, %cst_12 {dimension_numbers = #tpu.dot_dimension_numbers<[1], [0], [0], [1], [0, 0, 1, 1], [], []>} : vector<8x128xf32>, vector<128x128xf32>, vector<8x128xf32> -> vector<8x128xf32>
    %15 = vector.broadcast %13 : vector<1x128xf32> to vector<8x128xf32>
    %16 = arith.addf %14, %15 : vector<8x128xf32>
    %cst_13 = arith.constant 0.000000e+00 : f32
    %17 = vector.broadcast %cst_13 : f32 to vector<8x128xf32>
    %18 = arith.maximumf %16, %17 : vector<8x128xf32>
    %c0_14 = arith.constant 0 : index
    %c0_15 = arith.constant 0 : index
    %19 = vector.load %arg5[%c0_14, %c0_15] : memref<128x128xf32, #tpu.memory_space<vmem>>, vector<128x128xf32>
    %c0_16 = arith.constant 0 : index
    %c0_17 = arith.constant 0 : index
    %20 = vector.load %arg6[%c0_16, %c0_17] : memref<1x128xf32, #tpu.memory_space<vmem>>, vector<1x128xf32>
    %cst_18 = arith.constant dense<0.000000e+00> : vector<8x128xf32>
    %21 = tpu.matmul %18, %19, %cst_18 {dimension_numbers = #tpu.dot_dimension_numbers<[1], [0], [0], [1], [0, 0, 1, 1], [], []>} : vector<8x128xf32>, vector<128x128xf32>, vector<8x128xf32> -> vector<8x128xf32>
    %22 = vector.broadcast %20 : vector<1x128xf32> to vector<8x128xf32>
    %23 = arith.addf %21, %22 : vector<8x128xf32>
    %c0_19 = arith.constant 0 : index
    %c0_20 = arith.constant 0 : index
    %24 = vector.load %arg7[%c0_19, %c0_20] : memref<8x128xf32, #tpu.memory_space<vmem>>, vector<8x128xf32>
    tpu.vector_store %arg7[%c0_19, %c0_20], %23 {strides = array<i32>} : memref<8x128xf32, #tpu.memory_space<vmem>>, vector<8x128xf32>,
    return
  }
}

</mosaic_0001>

<bundles_post_ra>
// kernel: tpu_custom_call.1
= control target key start
LH: loop header
LB: loop body
LE: loop exit
PB: predicated region body
PF: predicated region fallthrough
CT: control target
= control target key end

     0   :  { %12 = vsyncpa [#allocation3], 0  ;;  %s723_s0 = inlined_call_operand.hbm [shape: f32[8,1024], index: 0, kind: input, shape index: {}]   ;;  %s724_s1 = inlined_call_operand.hbm [shape: f32[1024,128], index: 1, kind: input, shape index: {}]   ;;  %s725_s2 = inlined_call_operand.vmem [shape: f32[1,128], index: 2, kind: input, shape index: {}]   ;;  %s726_s3 = inlined_call_operand.hbm [shape: f32[128,128], index: 3, kind: input, shape index: {}]   ;;  %s727_s4 = inlined_call_operand.vmem [shape: f32[1,128], index: 4, kind: input, shape index: {}]   ;;  %s728_s5 = inlined_call_operand.hbm [shape: f32[128,128], index: 5, kind: input, shape index: {}]   ;;  %s729_s6 = inlined_call_operand.vmem [shape: f32[1,128], index: 6, kind: input, shape index: {}]   ;;  %s730_s7 = inlined_call_operand.hbm [shape: f32[8,128], index: 7, kind: output, shape index: {}]  }
   0x1   :  { %13 = vsyncpa [#allocation6], 0 }
   0x2   :  { %14 = vsyncpa [#allocation9], 0  ;;  %s31_s26 = sshll.u32 %s724_s1, 4  ;;  %s32_s26 = int_to_ptr.hbm [resolvable:$true] %s31_s26 }
   0x3   :  { %15 = vsyncpa [#allocation4], 0  ;;  %s652_s27 = smov [#allocation5]   ;;  %s21_s8 = sshll.u32 %s723_s0, 4  ;;  %s22_s8 = int_to_ptr.hbm [resolvable:$true] %s21_s8 }
   0x4   :  { %s33_s28 = sshll.u32 %s652_s27, 4  ;;  %s653_s9 = smov 128   ;;  %s34_s28 = int_to_ptr.vmem [resolvable:$true] %s33_s28 }
   0x5   :  { %s654_s10 = smov 8   ;;  %s655_s11 = smov [#allocation2]  }
   0x6   :  { %39 = dma.hbm_to_vmem [thread:$0]  %s32_s26, 16384, %s34_s28, [#allocation6], %s653_s9, %s653_s9, %s654_s10  }
   0x7   :  { %s23_s12 = sshll.u32 %s655_s11, 4  ;;  %s46_s15 = sshll.u32 %s726_s3, 4  ;;  %s24_s12 = int_to_ptr.vmem [resolvable:$true] %s23_s12  ;;  %s47_s15 = int_to_ptr.hbm [resolvable:$true] %s46_s15 }
   0x8   :  { %26 = dma.hbm_to_vmem [thread:$0]  %s22_s8, 1024, %s24_s12, [#allocation3]  }
   0x9   :  { %s61_s17 = sshll.u32 %s728_s5, 4  ;;  %s656_s18 = smov [#allocation7]   ;;  %s62_s17 = int_to_ptr.hbm [resolvable:$true] %s61_s17 }
   0xa   :  { %s48_s19 = sshll.u32 %s656_s18, 4  ;;  %s657_s0 = smov [#allocation8]   ;;  %s49_s19 = int_to_ptr.vmem [resolvable:$true] %s48_s19 }
   0xb   :  { %54 = dma.hbm_to_vmem [thread:$0]  %s47_s15, 2048, %s49_s19, [#allocation6], %s653_s9, %s653_s9, %s654_s10  }
   0xc   :  { %s63_s20 = sshll.u32 %s657_s0, 4  ;;  %s64_s20 = int_to_ptr.vmem [resolvable:$true] %s63_s20 }
   0xd   :  { %69 = dma.hbm_to_vmem [thread:$0]  %s62_s17, 2048, %s64_s20, [#allocation9], %s653_s9, %s653_s9, %s654_s10  }
   0xe   :  { %644 = dma.done.wait [#allocation3], 1024  }
   0xf   :  { %645 = vsyncadd [#allocation3], 4294966272 }
  0x10   :  { %646 = dma.done.wait [#allocation6], 18432  }
  0x11   :  { %647 = vsyncadd [#allocation6], 4294948864 }
  0x12   :  { %648 = dma.done.wait [#allocation9], 2048  }
  0x13   :  { %649 = vsyncadd [#allocation9], 4294965248  ;;  %v159_v0 = vld [vmem:[#allocation5 + $0x178] sm:$0xff]  ;;  %v158_v2 = vld [vmem:[#allocation5 + $0x170] sm:$0xff]  ;;  %s658_s24 = smov [#allocation10]   ;;  %s494_s28 = sshll.u32 %s730_s7, 4  ;;  %s495_s28 = int_to_ptr.hbm [resolvable:$true] %s494_s28 }
  0x14   :  { %v127_v1 = vld [vmem:[#allocation5 + $0x78] sm:$0xff]  ;;  %284 = vmatpush.msra.mxu2 %v159_v0  ;;  %v126_v4 = vld [vmem:[#allocation5 + $0x70] sm:$0xff]  ;;  %v157_v6 = vld [vmem:[#allocation5 + $0x168] sm:$0xff]  ;;  %s492_s25 = sshll.u32 %s658_s24, 4  ;;  %s493_s25 = int_to_ptr.vmem [resolvable:$true] %s492_s25 }
  0x15   :  { %244 = vmatpush.msra.mxu0 %v127_v1  ;;  %v175_v3 = vld [vmem:[#allocation5 + $0x1f8] sm:$0xff]  ;;  %v174_v7 = vld [vmem:[#allocation5 + $0x1f0] sm:$0xff]  ;;  %v125_v8 = vld [vmem:[#allocation5 + $0x68] sm:$0xff] }
  0x16   :  { %v143_v5 = vld [vmem:[#allocation5 + $0xf8] sm:$0xff]  ;;  %304 = vmatpush.msra.mxu3 %v175_v3  ;;  %285 = vmatpush.msra.mxu2 %v158_v2  ;;  %v142_v9 = vld [vmem:[#allocation5 + $0xf0] sm:$0xff]  ;;  %v173_v10 = vld [vmem:[#allocation5 + $0x1e8] sm:$0xff] }
  0x17   :  { %264 = vmatpush.msra.mxu1 %v143_v5  ;;  %245 = vmatpush.msra.mxu0 %v126_v4  ;;  %v156_v11 = vld [vmem:[#allocation5 + $0x160] sm:$0xff]  ;;  %v141_v13 = vld [vmem:[#allocation5 + $0xe8] sm:$0xff]  ;;  %v155_v16 = vld [vmem:[#allocation5 + $0x158] sm:$0xff] }
  0x18   :  { %305 = vmatpush.msra.mxu3 %v174_v7  ;;  %v124_v12 = vld [vmem:[#allocation5 + $0x60] sm:$0xff]  ;;  %286 = vmatpush.msra.mxu2 %v157_v6  ;;  %v123_v17 = vld [vmem:[#allocation5 + $0x58] sm:$0xff]  ;;  %v154_v20 = vld [vmem:[#allocation5 + $0x150] sm:$0xff] }
  0x19   :  { %265 = vmatpush.msra.mxu1 %v142_v9  ;;  %246 = vmatpush.msra.mxu0 %v125_v8  ;;  %v172_v14 = vld [vmem:[#allocation5 + $0x1e0] sm:$0xff]  ;;  %v171_v18 = vld [vmem:[#allocation5 + $0x1d8] sm:$0xff]  ;;  %v122_v21 = vld [vmem:[#allocation5 + $0x50] sm:$0xff] }
  0x1a   :  { %v140_v15 = vld [vmem:[#allocation5 + $0xe0] sm:$0xff]  ;;  %306 = vmatpush.msra.mxu3 %v173_v10  ;;  %287 = vmatpush.msra.mxu2 %v156_v11  ;;  %v139_v19 = vld [vmem:[#allocation5 + $0xd8] sm:$0xff]  ;;  %v170_v22 = vld [vmem:[#allocation5 + $0x1d0] sm:$0xff] }
  0x1b   :  { %266 = vmatpush.msra.mxu1 %v141_v13  ;;  %247 = vmatpush.msra.mxu0 %v124_v12  ;;  %v138_v23 = vld [vmem:[#allocation5 + $0xd0] sm:$0xff]  ;;  %v153_v24 = vld [vmem:[#allocation5 + $0x148] sm:$0xff]  ;;  %v152_v28 = vld [vmem:[#allocation5 + $0x140] sm:$0xff] }
  0x1c   :  { %307 = vmatpush.msra.mxu3 %v172_v14  ;;  %288 = vmatpush.msra.mxu2 %v155_v16  ;;  %v121_v25 = vld [vmem:[#allocation5 + $0x48] sm:$0xff]  ;;  %v120_v29 = vld [vmem:[#allocation5 + $0x40] sm:$0xff]  ;;  %v151_v32 = vld [vmem:[#allocation5 + $0x138] sm:$0xff] }
  0x1d   :  { %267 = vmatpush.msra.mxu1 %v140_v15  ;;  %248 = vmatpush.msra.mxu0 %v123_v17  ;;  %v169_v26 = vld [vmem:[#allocation5 + $0x1c8] sm:$0xff]  ;;  %v168_v30 = vld [vmem:[#allocation5 + $0x1c0] sm:$0xff]  ;;  %v119_v33 = vld [vmem:[#allocation5 + $0x38] sm:$0xff] }
  0x1e   :  { %308 = vmatpush.msra.mxu3 %v171_v18  ;;  %289 = vmatpush.msra.mxu2 %v154_v20  ;;  %v137_v27 = vld [vmem:[#allocation5 + $0xc8] sm:$0xff]  ;;  %v136_v31 = vld [vmem:[#allocation5 + $0xc0] sm:$0xff]  ;;  %v167_v34 = vld [vmem:[#allocation5 + $0x1b8] sm:$0xff] }
  0x1f   :  { %268 = vmatpush.msra.mxu1 %v139_v19  ;;  %249 = vmatpush.msra.mxu0 %v122_v21  ;;  %v135_v35 = vld [vmem:[#allocation5 + $0xb8] sm:$0xff]  ;;  %v150_v36 = vld [vmem:[#allocation5 + $0x130] sm:$0xff]  ;;  %v149_v40 = vld [vmem:[#allocation5 + $0x128] sm:$0xff] }
  0x20   :  { %309 = vmatpush.msra.mxu3 %v170_v22  ;;  %290 = vmatpush.msra.mxu2 %v153_v24  ;;  %v118_v37 = vld [vmem:[#allocation5 + $0x30] sm:$0xff]  ;;  %v117_v41 = vld [vmem:[#allocation5 + $0x28] sm:$0xff]  ;;  %v148_v44 = vld [vmem:[#allocation5 + $0x120] sm:$0xff] }
  0x21   :  { %269 = vmatpush.msra.mxu1 %v138_v23  ;;  %250 = vmatpush.msra.mxu0 %v121_v25  ;;  %v166_v38 = vld [vmem:[#allocation5 + $0x1b0] sm:$0xff]  ;;  %v165_v42 = vld [vmem:[#allocation5 + $0x1a8] sm:$0xff]  ;;  %v116_v45 = vld [vmem:[#allocation5 + $0x20] sm:$0xff] }
  0x22   :  { %310 = vmatpush.msra.mxu3 %v169_v26  ;;  %291 = vmatpush.msra.mxu2 %v152_v28  ;;  %v134_v39 = vld [vmem:[#allocation5 + $0xb0] sm:$0xff]  ;;  %v133_v43 = vld [vmem:[#allocation5 + $0xa8] sm:$0xff]  ;;  %v164_v46 = vld [vmem:[#allocation5 + $0x1a0] sm:$0xff] }
  0x23   :  { %270 = vmatpush.msra.mxu1 %v137_v27  ;;  %251 = vmatpush.msra.mxu0 %v120_v29  ;;  %v132_v47 = vld [vmem:[#allocation5 + $0xa0] sm:$0xff]  ;;  %v147_v48 = vld [vmem:[#allocation5 + $0x118] sm:$0xff]  ;;  %v146_v52 = vld [vmem:[#allocation5 + $0x110] sm:$0xff] }
  0x24   :  { %311 = vmatpush.msra.mxu3 %v168_v30  ;;  %292 = vmatpush.msra.mxu2 %v151_v32  ;;  %v115_v49 = vld [vmem:[#allocation5 + $0x18] sm:$0xff]  ;;  %v114_v53 = vld [vmem:[#allocation5 + $0x10] sm:$0xff]  ;;  %v145_v56 = vld [vmem:[#allocation5 + $0x108] sm:$0xff] }
  0x25   :  { %271 = vmatpush.msra.mxu1 %v136_v31  ;;  %252 = vmatpush.msra.mxu0 %v119_v33  ;;  %v163_v50 = vld [vmem:[#allocation5 + $0x198] sm:$0xff]  ;;  %v162_v54 = vld [vmem:[#allocation5 + $0x190] sm:$0xff]  ;;  %v113_v57 = vld [vmem:[#allocation5 + $0x8] sm:$0xff] }
  0x26   :  { %312 = vmatpush.msra.mxu3 %v167_v34  ;;  %293 = vmatpush.msra.mxu2 %v150_v36  ;;  %v131_v51 = vld [vmem:[#allocation5 + $0x98] sm:$0xff]  ;;  %v130_v55 = vld [vmem:[#allocation5 + $0x90] sm:$0xff]  ;;  %v161_v58 = vld [vmem:[#allocation5 + $0x188] sm:$0xff] }
  0x27   :  { %272 = vmatpush.msra.mxu1 %v135_v35  ;;  %253 = vmatpush.msra.mxu0 %v118_v37  ;;  %v129_v59 = vld [vmem:[#allocation5 + $0x88] sm:$0xff]  ;;  %v144_v60 = vld [vmem:[#allocation5 + $0x100] sm:$0xff]  ;;  %v223_v62 = vld [vmem:[#allocation5 + $0x378] sm:$0xff] }
  0x28   :  { %313 = vmatpush.msra.mxu3 %v166_v38  ;;  %294 = vmatpush.msra.mxu2 %v149_v40  ;;  %v112_v61 = vld [vmem:[#allocation5] sm:$0xff]  ;;  %v191_v0 = vld [vmem:[#allocation5 + $0x278] sm:$0xff]  ;;  %v222_v2 = vld [vmem:[#allocation5 + $0x370] sm:$0xff] }
  0x29   :  { %273 = vmatpush.msra.mxu1 %v134_v39  ;;  %254 = vmatpush.msra.mxu0 %v117_v41  ;;  %v160_v63 = vld [vmem:[#allocation5 + $0x180] sm:$0xff]  ;;  %v239_v1 = vld [vmem:[#allocation5 + $0x3f8] sm:$0xff]  ;;  %v190_v4 = vld [vmem:[#allocation5 + $0x270] sm:$0xff] }
  0x2a   :  { %314 = vmatpush.msra.mxu3 %v165_v42  ;;  %295 = vmatpush.msra.mxu2 %v148_v44  ;;  %v128_v3 = vld [vmem:[#allocation5 + $0x80] sm:$0xff]  ;;  %v207_v5 = vld [vmem:[#allocation5 + $0x2f8] sm:$0xff]  ;;  %v221_v6 = vld [vmem:[#allocation5 + $0x368] sm:$0xff] }
  0x2b   :  { %274 = vmatpush.msra.mxu1 %v133_v43  ;;  %255 = vmatpush.msra.mxu0 %v116_v45  ;;  %v238_v7 = vld [vmem:[#allocation5 + $0x3f0] sm:$0xff]  ;;  %v189_v8 = vld [vmem:[#allocation5 + $0x268] sm:$0xff]  ;;  %v220_v10 = vld [vmem:[#allocation5 + $0x360] sm:$0xff] }
  0x2c   :  { %315 = vmatpush.msra.mxu3 %v164_v46  ;;  %296 = vmatpush.msra.mxu2 %v147_v48  ;;  %v206_v9 = vld [vmem:[#allocation5 + $0x2f0] sm:$0xff]  ;;  %v237_v11 = vld [vmem:[#allocation5 + $0x3e8] sm:$0xff]  ;;  %v188_v12 = vld [vmem:[#allocation5 + $0x260] sm:$0xff] }
  0x2d   :  { %275 = vmatpush.msra.mxu1 %v132_v47  ;;  %256 = vmatpush.msra.mxu0 %v115_v49  ;;  %v205_v13 = vld [vmem:[#allocation5 + $0x2e8] sm:$0xff]  ;;  %v219_v14 = vld [vmem:[#allocation5 + $0x358] sm:$0xff]  ;;  %v236_v15 = vld [vmem:[#allocation5 + $0x3e0] sm:$0xff] }
  0x2e   :  { %316 = vmatpush.msra.mxu3 %v163_v50  ;;  %297 = vmatpush.msra.mxu2 %v146_v52  ;;  %v187_v16 = vld [vmem:[#allocation5 + $0x258] sm:$0xff]  ;;  %v204_v17 = vld [vmem:[#allocation5 + $0x2e0] sm:$0xff]  ;;  %v218_v18 = vld [vmem:[#allocation5 + $0x350] sm:$0xff] }
  0x2f   :  { %276 = vmatpush.msra.mxu1 %v131_v51  ;;  %257 = vmatpush.msra.mxu0 %v114_v53  ;;  %v235_v19 = vld [vmem:[#allocation5 + $0x3d8] sm:$0xff]  ;;  %v186_v20 = vld [vmem:[#allocation5 + $0x250] sm:$0xff]  ;;  %v217_v22 = vld [vmem:[#allocation5 + $0x348] sm:$0xff] }
  0x30   :  { %317 = vmatpush.msra.mxu3 %v162_v54  ;;  %298 = vmatpush.msra.mxu2 %v145_v56  ;;  %v203_v21 = vld [vmem:[#allocation5 + $0x2d8] sm:$0xff]  ;;  %v234_v23 = vld [vmem:[#allocation5 + $0x3d0] sm:$0xff]  ;;  %v185_v24 = vld [vmem:[#allocation5 + $0x248] sm:$0xff] }
  0x31   :  { %277 = vmatpush.msra.mxu1 %v130_v55  ;;  %258 = vmatpush.msra.mxu0 %v113_v57  ;;  %v202_v25 = vld [vmem:[#allocation5 + $0x2d0] sm:$0xff]  ;;  %v216_v26 = vld [vmem:[#allocation5 + $0x340] sm:$0xff]  ;;  %v233_v27 = vld [vmem:[#allocation5 + $0x3c8] sm:$0xff] }
  0x32   :  { %318 = vmatpush.msra.mxu3 %v161_v58  ;;  %299 = vmatpush.msra.mxu2 %v144_v60  ;;  %v184_v28 = vld [vmem:[#allocation5 + $0x240] sm:$0xff]  ;;  %v201_v29 = vld [vmem:[#allocation5 + $0x2c8] sm:$0xff]  ;;  %v215_v30 = vld [vmem:[#allocation5 + $0x338] sm:$0xff] }
  0x33   :  { %278 = vmatpush.msra.mxu1 %v129_v59  ;;  %259 = vmatpush.msra.mxu0 %v112_v61  ;;  %v90_v31 = vld [vmem:[#allocation2 + $0x10] sm:$0xff]  ;;  %v232_v32 = vld [vmem:[#allocation5 + $0x3c0] sm:$0xff]  ;;  %v183_v33 = vld [vmem:[#allocation5 + $0x238] sm:$0xff] }
  0x34   :  { %364 = vmatpush.msrb.mxu2 %v223_v62  ;;  %319 = vmatpush.msra.mxu3 %v160_v63  ;;  %v200_v34 = vld [vmem:[#allocation5 + $0x2c0] sm:$0xff]  ;;  %v214_v35 = vld [vmem:[#allocation5 + $0x330] sm:$0xff]  ;;  %v231_v36 = vld [vmem:[#allocation5 + $0x3b8] sm:$0xff]  ;;  %v508_v39 = vadd.f32 -0.5, %v90_v31 }
  0x35   :  { %324 = vmatpush.msrb.mxu0 %v191_v0  ;;  %279 = vmatpush.msra.mxu1 %v128_v3  ;;  %v88_v37 = vld [vmem:[#allocation2] sm:$0xff]  ;;  %v182_v38 = vld [vmem:[#allocation5 + $0x230] sm:$0xff]  ;;  %v91_v40 = vld [vmem:[#allocation2 + $0x18] sm:$0xff] }
  0x36   :  { %384 = vmatpush.msrb.mxu3 %v239_v1  ;;  %365 = vmatpush.msrb.mxu2 %v222_v2  ;;  %v199_v41 = vld [vmem:[#allocation5 + $0x2b8] sm:$0xff]  ;;  %v213_v42 = vld [vmem:[#allocation5 + $0x328] sm:$0xff]  ;;  %v230_v43 = vld [vmem:[#allocation5 + $0x3b0] sm:$0xff]  ;;  %v506_v44 = vadd.f32 -0.5, %v88_v37  ;;  %v509_v48 = vadd.f32 -0.5, %v91_v40  ;;  %v106_v51 = vmul.f32 0.5, %v508_v39 }
  0x37   :  { %325 = vmatpush.msrb.mxu0 %v190_v4  ;;  %344 = vmatpush.msrb.mxu1 %v207_v5  ;;  %v89_v45 = vld [vmem:[#allocation2 + $0x8] sm:$0xff]  ;;  %v198_v47 = vld [vmem:[#allocation5 + $0x2b0] sm:$0xff]  ;;  %v212_v49 = vld [vmem:[#allocation5 + $0x320] sm:$0xff] }
  0x38   :  { %366 = vmatpush.msrb.mxu2 %v221_v6  ;;  %385 = vmatpush.msrb.mxu3 %v238_v7  ;;  %v181_v46 = vld [vmem:[#allocation5 + $0x228] sm:$0xff]  ;;  %v180_v52 = vld [vmem:[#allocation5 + $0x220] sm:$0xff]  ;;  %v507_v53 = vadd.f32 -0.5, %v89_v45  ;;  %v211_v55 = vld [vmem:[#allocation5 + $0x318] sm:$0xff]  ;;  %v104_v56 = vmul.f32 0.5, %v506_v44  ;;  %v107_v58 = vmul.f32 0.5, %v509_v48 }
  0x39   :  { %326 = vmatpush.msrb.mxu0 %v189_v8  ;;  %345 = vmatpush.msrb.mxu1 %v206_v9  ;;  %v229_v50 = vld [vmem:[#allocation5 + $0x3a8] sm:$0xff]  ;;  %v228_v57 = vld [vmem:[#allocation5 + $0x3a0] sm:$0xff]  ;;  %v94_v59 = vld [vmem:[#allocation2 + $0x30] sm:$0xff] }
  0x3a   :  { %367 = vmatpush.msrb.mxu2 %v220_v10  ;;  %386 = vmatpush.msrb.mxu3 %v237_v11  ;;  %v197_v54 = vld [vmem:[#allocation5 + $0x2a8] sm:$0xff]  ;;  %v179_v60 = vld [vmem:[#allocation5 + $0x218] sm:$0xff]  ;;  %v196_v61 = vld [vmem:[#allocation5 + $0x2a0] sm:$0xff]  ;;  %v105_v63 = vmul.f32 0.5, %v507_v53  ;;  %v512_v3 = vadd.f32 -0.5, %v94_v59 }
  0x3b   :  { %327 = vmatpush.msrb.mxu0 %v188_v12  ;;  %346 = vmatpush.msrb.mxu1 %v205_v13  ;;  %v210_v62 = vld [vmem:[#allocation5 + $0x310] sm:$0xff]  ;;  %v92_v0 = vld [vmem:[#allocation2 + $0x20] sm:$0xff]  ;;  %v95_v1 = vld [vmem:[#allocation2 + $0x38] sm:$0xff] }
  0x3c   :  { %368 = vmatpush.msrb.mxu2 %v219_v14  ;;  %387 = vmatpush.msrb.mxu3 %v236_v15  ;;  %v227_v2 = vld [vmem:[#allocation5 + $0x398] sm:$0xff]  ;;  %v178_v4 = vld [vmem:[#allocation5 + $0x210] sm:$0xff]  ;;  %v93_v6 = vld [vmem:[#allocation2 + $0x28] sm:$0xff]  ;;  %v510_v9 = vadd.f32 -0.5, %v92_v0  ;;  %v513_v10 = vadd.f32 -0.5, %v95_v1  ;;  %v110_v15 = vmul.f32 0.5, %v512_v3 }
  0x3d   :  { %328 = vmatpush.msrb.mxu0 %v187_v16  ;;  %347 = vmatpush.msrb.mxu1 %v204_v17  ;;  %v195_v5 = vld [vmem:[#allocation5 + $0x298] sm:$0xff]  ;;  %v209_v7 = vld [vmem:[#allocation5 + $0x308] sm:$0xff]  ;;  %v226_v8 = vld [vmem:[#allocation5 + $0x390] sm:$0xff]  ;;  %v511_v16 = vadd.f32 -0.5, %v93_v6 }
  0x3e   :  { %369 = vmatpush.msrb.mxu2 %v218_v18  ;;  %388 = vmatpush.msrb.mxu3 %v235_v19  ;;  %v177_v11 = vld [vmem:[#allocation5 + $0x208] sm:$0xff]  ;;  %v194_v12 = vld [vmem:[#allocation5 + $0x290] sm:$0xff]  ;;  %v208_v13 = vld [vmem:[#allocation5 + $0x300] sm:$0xff] }
  0x3f   :  { %329 = vmatpush.msrb.mxu0 %v186_v20  ;;  %348 = vmatpush.msrb.mxu1 %v203_v21  ;;  %v225_v14 = vld [vmem:[#allocation5 + $0x388] sm:$0xff]  ;;  %v176_v17 = vld [vmem:[#allocation5 + $0x200] sm:$0xff]  ;;  %v108_v20 = vmul.f32 0.5, %v510_v9  ;;  %v111_v21 = vmul.f32 0.5, %v513_v10  ;;  %v407_v37 = vld [vmem:[#allocation7 + $0x10] sm:$0xff] }
  0x40   :  { %370 = vmatpush.msrb.mxu2 %v217_v22  ;;  %389 = vmatpush.msrb.mxu3 %v234_v23  ;;  %v193_v18 = vld [vmem:[#allocation5 + $0x288] sm:$0xff]  ;;  %v224_v19 = vld [vmem:[#allocation5 + $0x380] sm:$0xff]  ;;  %v109_v23 = vmul.f32 0.5, %v511_v16  ;;  %v461_v40 = vld [vmem:[#allocation8 + $0x78] sm:$0xff] }
  0x41   :  { %330 = vmatpush.msrb.mxu0 %v185_v24  ;;  %349 = vmatpush.msrb.mxu1 %v202_v25  ;;  %v192_v22 = vld [vmem:[#allocation5 + $0x280] sm:$0xff]  ;;  %v420_v24 = vld [vmem:[#allocation7 + $0x78] sm:$0xff]  ;;  %v419_v25 = vld [vmem:[#allocation7 + $0x70] sm:$0xff] }
  0x42   :  { %371 = vmatpush.msrb.mxu2 %v216_v26  ;;  %390 = vmatpush.msrb.mxu3 %v233_v27  ;;  %v418_v26 = vld [vmem:[#allocation7 + $0x68] sm:$0xff]  ;;  %v417_v27 = vld [vmem:[#allocation7 + $0x60] sm:$0xff]  ;;  %v457_v44 = vld [vmem:[#allocation8 + $0x58] sm:$0xff] }
  0x43   :  { %331 = vmatpush.msrb.mxu0 %v184_v28  ;;  %350 = vmatpush.msrb.mxu1 %v201_v29  ;;  %v416_v28 = vld [vmem:[#allocation7 + $0x58] sm:$0xff]  ;;  %v415_v29 = vld [vmem:[#allocation7 + $0x50] sm:$0xff]  ;;  %v413_v31 = vld [vmem:[#allocation7 + $0x40] sm:$0xff] }
  0x44   :  { %372 = vmatpush.msrb.mxu2 %v215_v30  ;;  %391 = vmatpush.msrb.mxu3 %v232_v32  ;;  %v414_v30 = vld [vmem:[#allocation7 + $0x48] sm:$0xff]  ;;  %v412_v32 = vld [vmem:[#allocation7 + $0x38] sm:$0xff]  ;;  %v405_v39 = vld [vmem:[#allocation7] sm:$0xff] }
  0x45   :  { %332 = vmatpush.msrb.mxu0 %v183_v33  ;;  %351 = vmatpush.msrb.mxu1 %v200_v34  ;;  %v411_v33 = vld [vmem:[#allocation7 + $0x30] sm:$0xff]  ;;  %v410_v34 = vld [vmem:[#allocation7 + $0x28] sm:$0xff]  ;;  %v521_v45 = vld [vmem:[%s725_s2] ss:$0 sm:$0xff] }
  0x46   :  { %373 = vmatpush.msrb.mxu2 %v214_v35  ;;  %392 = vmatpush.msrb.mxu3 %v231_v36  ;;  %v409_v35 = vld [vmem:[#allocation7 + $0x20] sm:$0xff]  ;;  %v408_v36 = vld [vmem:[#allocation7 + $0x18] sm:$0xff] }
  0x47   :  { %333 = vmatpush.msrb.mxu0 %v182_v38  ;;  %352 = vmatpush.msrb.mxu1 %v199_v41  ;;  %v406_v38 = vld [vmem:[#allocation7 + $0x8] sm:$0xff]  ;;  %v460_v41 = vld [vmem:[#allocation8 + $0x70] sm:$0xff]  ;;  %v446_v9 = vld [vmem:[#allocation8] sm:$0xff] }
  0x48   :  { %374 = vmatpush.msrb.mxu2 %v213_v42  ;;  %393 = vmatpush.msrb.mxu3 %v230_v43  ;;  %v459_v42 = vld [vmem:[#allocation8 + $0x68] sm:$0xff]  ;;  %v458_v43 = vld [vmem:[#allocation8 + $0x60] sm:$0xff] }
  0x49   :  { %334 = vmatpush.msrb.mxu0 %v181_v46  ;;  %353 = vmatpush.msrb.mxu1 %v198_v47  ;;  %v456_v46 = vld [vmem:[#allocation8 + $0x50] sm:$0xff]  ;;  %v455_v47 = vld [vmem:[#allocation8 + $0x48] sm:$0xff]  ;;  %v522_v10 = vld [vmem:[%s727_s4] ss:$0 sm:$0xff] }
  0x4a   :  { %375 = vmatpush.msrb.mxu2 %v212_v49  ;;  %394 = vmatpush.msrb.mxu3 %v229_v50  ;;  %v454_v50 = vld [vmem:[#allocation8 + $0x40] sm:$0xff] }
  0x4b   :  { %300 = vmatmul.f32.vlgmr.msra.gmra.mxu2 %v106_v51  ;;  %335 = vmatpush.msrb.mxu0 %v180_v52  ;;  %v453_v52 = vld [vmem:[#allocation8 + $0x38] sm:$0xff] }
  0x4c   :  { %354 = vmatpush.msrb.mxu1 %v197_v54  ;;  %376 = vmatpush.msrb.mxu2 %v211_v55  ;;  %v452_v55 = vld [vmem:[#allocation8 + $0x30] sm:$0xff] }
  0x4d   :  { %395 = vmatpush.msrb.mxu3 %v228_v57  ;;  %260 = vmatmul.f32.vlgmr.msra.gmra.mxu0 %v104_v56 }
  0x4e   :  { %320 = vmatmul.f32.vlgmr.msra.gmra.mxu3 %v107_v58  ;;  %336 = vmatpush.msrb.mxu0 %v179_v60  ;;  %v451_v58 = vld [vmem:[#allocation8 + $0x28] sm:$0xff]  ;;  %v450_v60 = vld [vmem:[#allocation8 + $0x20] sm:$0xff] }
  0x4f   :  { %355 = vmatpush.msrb.mxu1 %v196_v61  ;;  %377 = vmatpush.msrb.mxu2 %v210_v62 }
  0x50   :  { %396 = vmatpush.msrb.mxu3 %v227_v2  ;;  %280 = vmatmul.f32.vlgmr.msra.gmra.mxu1 %v105_v63  ;;  %v449_v63 = vld [vmem:[#allocation8 + $0x18] sm:$0xff] }
  0x51   :  { %337 = vmatpush.msrb.mxu0 %v178_v4  ;;  %356 = vmatpush.msrb.mxu1 %v195_v5 }
  0x52   :  { %378 = vmatpush.msrb.mxu2 %v209_v7  ;;  %397 = vmatpush.msrb.mxu3 %v226_v8  ;;  %v448_v7 = vld [vmem:[#allocation8 + $0x10] sm:$0xff]  ;;  %v447_v8 = vld [vmem:[#allocation8 + $0x8] sm:$0xff] }
  0x53   :  { %338 = vmatpush.msrb.mxu0 %v177_v11  ;;  %357 = vmatpush.msrb.mxu1 %v194_v12 }
  0x54   :  { %379 = vmatpush.msrb.mxu2 %v208_v13  ;;  %398 = vmatpush.msrb.mxu3 %v225_v14  ;;  %v523_v14 = vld [vmem:[%s729_s6] ss:$0 sm:$0xff] }
  0x55   :  { %380 = vmatmul.f32.vlgmr.msrb.gmra.mxu2 %v110_v15  ;;  %339 = vmatpush.msrb.mxu0 %v176_v17 }
  0x56   :  { %358 = vmatpush.msrb.mxu1 %v193_v18  ;;  %399 = vmatpush.msrb.mxu3 %v224_v19 }
  0x57   :  { %340 = vmatmul.f32.vlgmr.msrb.gmra.mxu0 %v108_v20  ;;  %400 = vmatmul.f32.vlgmr.msrb.gmra.mxu3 %v111_v21 }
  0x58   :  { %359 = vmatpush.msrb.mxu1 %v192_v22  ;;  %425 = vmatpush.msra.mxu0 %v420_v24 }
  0x59   :  { %360 = vmatmul.f32.vlgmr.msrb.gmra.mxu1 %v109_v23 }
  0x5a   :  { %426 = vmatpush.msra.mxu0 %v419_v25  ;;  %466 = vmatpush.msra.mxu1 %v461_v40 }
  0x5c   :  { %427 = vmatpush.msra.mxu0 %v418_v26  ;;  %467 = vmatpush.msra.mxu1 %v460_v41 }
  0x5e   :  { %428 = vmatpush.msra.mxu0 %v417_v27  ;;  %468 = vmatpush.msra.mxu1 %v459_v42 }
  0x60   :  { %429 = vmatpush.msra.mxu0 %v416_v28  ;;  %469 = vmatpush.msra.mxu1 %v458_v43 }
  0x62   :  { %430 = vmatpush.msra.mxu0 %v415_v29  ;;  %470 = vmatpush.msra.mxu1 %v457_v44 }
  0x64   :  { %431 = vmatpush.msra.mxu0 %v414_v30  ;;  %471 = vmatpush.msra.mxu1 %v456_v46 }
  0x66   :  { %432 = vmatpush.msra.mxu0 %v413_v31  ;;  %472 = vmatpush.msra.mxu1 %v455_v47 }
  0x68   :  { %433 = vmatpush.msra.mxu0 %v412_v32  ;;  %473 = vmatpush.msra.mxu1 %v454_v50 }
  0x6a   :  { %434 = vmatpush.msra.mxu0 %v411_v33  ;;  %474 = vmatpush.msra.mxu1 %v453_v52 }
  0x6c   :  { %435 = vmatpush.msra.mxu0 %v410_v34  ;;  %475 = vmatpush.msra.mxu1 %v452_v55 }
  0x6e   :  { %436 = vmatpush.msra.mxu0 %v409_v35  ;;  %476 = vmatpush.msra.mxu1 %v451_v58 }
  0x70   :  { %437 = vmatpush.msra.mxu0 %v408_v36  ;;  %477 = vmatpush.msra.mxu1 %v450_v60 }
  0x72   :  { %438 = vmatpush.msra.mxu0 %v407_v37  ;;  %478 = vmatpush.msra.mxu1 %v449_v63 }
  0x74   :  { %439 = vmatpush.msra.mxu0 %v406_v38  ;;  %479 = vmatpush.msra.mxu1 %v448_v7 }
  0x76   :  { %440 = vmatpush.msra.mxu0 %v405_v39  ;;  %480 = vmatpush.msra.mxu1 %v447_v8 }
  0x78   :  { %481 = vmatpush.msra.mxu1 %v446_v9 }
  0xca   :  { %v261_v48 = vpop.f32.mrf.mxu0 }
  0xcb   :  { %v262_v49 = vadd.f32 %v521_v45, %v261_v48 }
  0xcd   :  { %v281_v51 = vpop.f32.mrf.mxu1 }
  0xce   :  { %v282_v53 = vadd.f32 %v281_v51, %v262_v49  ;;  %v301_v54 = vpop.f32.mrf.mxu2 }
  0xd0   :  { %v302_v56 = vadd.f32 %v301_v54, %v282_v53 }
  0xd1   :  { %v321_v57 = vpop.f32.mrf.mxu3 }
  0xd2   :  { %v322_v59 = vadd.f32 %v321_v57, %v302_v56 }
  0xd4   :  { %v341_v61 = vpop.f32.mrf.mxu0 }
  0xd5   :  { %v342_v62 = vadd.f32 %v341_v61, %v322_v59 }
  0xd6   :  { %v361_v0 = vpop.f32.mrf.mxu1 }
  0xd7   :  { %v362_v1 = vadd.f32 %v361_v0, %v342_v62 }
  0xd8   :  { %v381_v2 = vpop.f32.mrf.mxu2 }
  0xd9   :  { %v382_v3 = vadd.f32 %v381_v2, %v362_v1 }
  0xda   :  { %v401_v4 = vpop.f32.mrf.mxu3 }
  0xdb   :  { %v402_v5 = vadd.f32 %v401_v4, %v382_v3 }
  0xdd   :  { %v404_v6 = vmax.f32 %v402_v5, 0.0 }
  0xdf   :  { %441 = vmatmul.f32.vlgmr.msra.gmra.mxu0 %v404_v6 }
 0x15c   :  { %v442_v11 = vpop.f32.mrf.mxu0 }
 0x15d   :  { %v443_v12 = vadd.f32 %v522_v10, %v442_v11 }
 0x15f   :  { %v445_v13 = vmax.f32 %v443_v12, 0.0 }
 0x161   :  { %482 = vmatmul.f32.vlgmr.msra.gmra.mxu1 %v445_v13 }
 0x1de   :  { %v483_v15 = vpop.f32.mrf.mxu1 }
 0x1df   :  { %v484_v16 = vadd.f32 %v523_v14, %v483_v15 }
 0x1e1   :  { %486 = vst [vmem:[#allocation10] sm:$0xff] %v484_v16 }
 0x1e2   :  { %497 = dma.vmem_to_hbm [thread:$0]  %s493_s25, 128, %s495_s28, [#allocation4]  }
 0x1e3   :  { %650 = dma.done.wait [#allocation4], 128  }
 0x1e4   :  { %651 = vsyncadd [#allocation4], 4294967168 }
 0x1e5   :  { %502 = vsyncpa [#allocation3], 1 }
 0x1e6   :  { %503 = vsyncpa [#allocation6], 1 }
 0x1e7   :  { %504 = vsyncpa [#allocation9], 1 }
 0x1e8   :  { %505 = vsyncpa [#allocation4], 1 }

</bundles_post_ra>
